<compile_context>
chip_gen: v7x
topology: tpu7x:2x2x1
jax: 0.10.0
libtpu: 0.0.40
codegen_flags: <defaults>
</compile_context>

<pallas_src>
import functools

import jax
import jax.numpy as jnp
from jax.experimental import pallas as pl
from jax.experimental.pallas import tpu as pltpu

EPS = 1e-5
_LANE = 128
_SUBLANE = 8
_MXU_M = 256                      # MXU M-dim granularity on v6e/v7x (multiple of v5e's 128)


def _round_up(x, m):
    return (x + m - 1) // m * m


def _vmem_capacity_bytes():
    try:
        return int(pltpu.get_tpu_info().vmem_capacity_bytes)
    except Exception:
        return 64 * 1024 * 1024   # conservative fallback (v7x per-core VMEM)


# ---------------------------------------------------------------------------
# Kernel: fused  relu(x @ W0' + b0') @ ... @ W_last + b_last
# (eval-mode BatchNorm of every non-final layer is pre-folded into W_i'/b_i';
#  eval-mode dropout is identity.)
# ---------------------------------------------------------------------------
def _mlp2_kernel(num_layers, x_ref, *rest):
    *param_refs, out_ref = rest
    h = x_ref[...]                                      # bf16 activations
    for i in range(num_layers):
        w = param_refs[2 * i][...]                      # bf16 [in, out]
        b = param_refs[2 * i + 1][...]                  # f32  [1, out]
        h = jnp.dot(h, w, preferred_element_type=jnp.float32) + b
        if i + 1 < num_layers:
            # ReLU activation; dropout = identity (eval mode). Recast to bf16 for the MXU.
            h = jnp.maximum(h, 0.0).astype(jnp.bfloat16)
    out_ref[...] = h.astype(out_ref.dtype)


# ---------------------------------------------------------------------------
# Parameter folding (eval-mode BN -> Linear), bf16 weights / f32 biases.
# ---------------------------------------------------------------------------
def fold_mlp2_params(linears, bns):
    """linears: list of (W [out,in], b [out])  (PyTorch layout)
       bns:     list of (gamma, beta, running_mean, running_var), one per non-final layer
       Returns list of (W' [in,out] bf16, b' [1,out] f32); BN folded in f32 first."""
    num_layers = len(linears)
    folded = []
    for i, (w, b) in enumerate(linears):
        wt = jnp.asarray(w, jnp.float32).T              # [in, out], pre-transposed for x @ W
        bb = jnp.asarray(b, jnp.float32)
        if i + 1 < num_layers:
            gamma, beta, mean, var = (jnp.asarray(t, jnp.float32) for t in bns[i])
            scale = gamma / jnp.sqrt(var + EPS)
            shift = beta - mean * scale
            wt = wt * scale[None, :]                    # fold BN scale into columns of W
            bb = bb * scale + shift                     # fold BN shift into bias
        folded.append((wt.astype(jnp.bfloat16), bb[None, :]))
    return folded


def _estimate_vmem_bytes(tile, in_dim, folded, num_out):
    # x block (bf16) and out block (f32) are double-buffered by the pipeline.
    io = 2 * (tile * in_dim * 2 + tile * num_out * 4)
    # Weights/biases are single-buffered (pl.Buffered(1)): block never changes.
    params = sum(int(w.size) * w.dtype.itemsize + int(b.size) * b.dtype.itemsize
                 for w, b in folded)
    # Intermediate activations: f32 accumulator + bf16 recast per layer output.
    acts = sum(tile * int(w.shape[1]) * (4 + 2) for w, _ in folded)
    scratch = 4 * 1024 * 1024     # Mosaic internal scratch headroom
    return io + params + acts + scratch


# ---------------------------------------------------------------------------
# pallas_call wrapper
# ---------------------------------------------------------------------------
def mlp2_forward(x, folded_params, num_classes, *, tile_rows=1024):
    """x: [N, hiddens[0]] -> logits [N, num_classes] (f32)."""
    n, in_dim = x.shape
    num_layers = len(folded_params)
    num_out = int(folded_params[-1][0].shape[1])
    assert num_out == num_classes

    if x.dtype != jnp.bfloat16:
        # MXU-native input dtype; also halves the kernel's HBM read traffic.
        x = x.astype(jnp.bfloat16)

    capacity = _vmem_capacity_bytes()
    budget = int(capacity * 0.75)                       # ~48 MiB on v7x, ~96 MiB on v5e/v6e

    # ---- row-tile selection --------------------------------------------------
    tile_cap_rows = _round_up(n, _SUBLANE)
    tile = min(tile_rows, tile_cap_rows)
    if n >= 2 * _MXU_M:
        # Keep >= 2 grid steps so v7x's second TensorCore gets work.
        tile = min(tile, _round_up(-(-n // 2), _MXU_M))
    # Multi-step grids use MXU-M granularity; a single all-rows block only needs sublane alignment.
    align = _MXU_M if (tile < tile_cap_rows and tile >= _MXU_M) else _SUBLANE
    tile = _round_up(tile, align)

    def est(t):
        return _estimate_vmem_bytes(t, in_dim, folded_params, num_out)

    while tile > align and est(tile) > budget:
        tile = max(align, _round_up(tile // 2, align))
    if est(tile) > budget and align > _SUBLANE:
        align = _SUBLANE
        while tile > align and est(tile) > budget:
            tile = max(align, _round_up(tile // 2, align))
    if est(tile) > budget:
        # TODO(synk): add a column-tiled (N/K-axis) fallback for very wide hidden layers.
        raise ValueError(
            f"MLP2 parameters exceed the per-core VMEM budget ({est(_SUBLANE)} B > {budget} B); "
            "a K/N-tiled variant is required.")

    grid = (pl.cdiv(n, tile),)

    est_bytes = est(tile)
    vmem_limit = None
    if est_bytes > 16 * 1024 * 1024:          # above the smallest default scoped limit (v5e)
        vmem_limit = max(min(int(est_bytes * 1.25), int(capacity * 0.9)), est_bytes)

    flops = 2 * n * sum(int(w.shape[0]) * int(w.shape[1]) for w, _ in folded_params)
    bytes_accessed = int(x.size) * 2 + n * num_out * 4 + sum(
        int(w.size) * 2 + int(b.size) * 4 for w, b in folded_params)
    cost = pl.CostEstimate(flops=flops, transcendentals=0, bytes_accessed=bytes_accessed)

    def _run(single_buffer_params):
        in_specs = [pl.BlockSpec((tile, in_dim), lambda i: (i, 0))]
        flat_args = [x]
        for w, b in folded_params:
            if single_buffer_params:
                # Weight/bias block never changes across the grid -> single buffer.
                in_specs.append(pl.BlockSpec(w.shape, lambda i: (0, 0),
                                             pipeline_mode=pl.Buffered(1)))
                in_specs.append(pl.BlockSpec(b.shape, lambda i: (0, 0),
                                             pipeline_mode=pl.Buffered(1)))
            else:
                in_specs.append(pl.BlockSpec(w.shape, lambda i: (0, 0)))
                in_specs.append(pl.BlockSpec(b.shape, lambda i: (0, 0)))
            flat_args.extend([w, b])

        return pl.pallas_call(
            functools.partial(_mlp2_kernel, num_layers),
            out_shape=jax.ShapeDtypeStruct((n, num_out), jnp.float32),
            grid_spec=pltpu.PrefetchScalarGridSpec(
                num_scalar_prefetch=0,
                grid=grid,
                in_specs=in_specs,
                out_specs=pl.BlockSpec((tile, num_out), lambda i: (i, 0)),
            ),
            compiler_params=pltpu.CompilerParams(
                dimension_semantics=("parallel",),
                vmem_limit_bytes=vmem_limit),
            cost_estimate=cost,
        )(*flat_args)

    try:
        return _run(True)
    except Exception:
        # pipeline_mode support varies across JAX versions; fall back to default buffering.
        return _run(False)


# ---------------------------------------------------------------------------
# Deterministic parameter construction (PyTorch layout) and references.
# ---------------------------------------------------------------------------
def make_mlp2_params(key, hiddens):
    linears, bns = [], []
    for i in range(len(hiddens) - 1):
        key, kw, kb, kg, kbe, km, kv = jax.random.split(key, 7)
        fan_in = hiddens[i]
        w = jax.random.normal(kw, (hiddens[i + 1], fan_in), jnp.float32) / jnp.sqrt(fan_in)
        b = 0.05 * jax.random.normal(kb, (hiddens[i + 1],), jnp.float32)
        linears.append((w, b))
        if i != len(hiddens) - 2:   # BatchNorm after every layer except the last
            gamma = 1.0 + 0.1 * jax.random.normal(kg, (hiddens[i + 1],), jnp.float32)
            beta = 0.1 * jax.random.normal(kbe, (hiddens[i + 1],), jnp.float32)
            mean = 0.2 * jax.random.normal(km, (hiddens[i + 1],), jnp.float32)
            var = 0.5 + jax.random.uniform(kv, (hiddens[i + 1],), jnp.float32)
            bns.append((gamma, beta, mean, var))
    return linears, bns


def reference_forward(x, linears, bns):
    """Pure-JAX f32 mirror of MLP2.forward in eval mode (ReLU activation, identity dropout)."""
    h = x
    num_layers = len(linears)
    for i, (w, b) in enumerate(linears):
        h = h @ w.T + b
        if i + 1 < num_layers:
            gamma, beta, mean, var = bns[i]
            h = (h - mean) / jnp.sqrt(var + EPS) * gamma + beta
            h = jnp.maximum(h, 0.0)
    return h


def folded_reference(x_bf16, folded):
    """Pure-JAX mirror of the exact bf16/f32 arithmetic the kernel performs."""
    h = x_bf16
    for i, (w, b) in enumerate(folded):
        h = jnp.dot(h, w, preferred_element_type=jnp.float32) + b
        if i + 1 < len(folded):
            h = jnp.maximum(h, 0.0).astype(jnp.bfloat16)
    return h


if __name__ == "__main__":
    key = jax.random.PRNGKey(0)
    hiddens = [32, 16, 4]        # MLP2(hiddens=[32,16,4], activation=relu, dropout=0.5), eval mode

    key, k_p = jax.random.split(key)
    linears, bns = make_mlp2_params(k_p, hiddens)
    folded = fold_mlp2_params(linears, bns)

    for n_rows in (37, 777):     # ragged single-block grid and ragged multi-block grid
        key, k_x = jax.random.split(key)
        x = jax.random.normal(k_x, (n_rows, hiddens[0]), jnp.float32)

        logits = jax.block_until_ready(mlp2_forward(x, folded, num_classes=hiddens[-1]))
        assert logits.shape == (n_rows, hiddens[-1])

        # (a) exact-mechanics check vs a pure-JAX mirror of the bf16-folded math.
        ref_bf16 = folded_reference(x.astype(jnp.bfloat16), folded)
        assert jnp.allclose(logits, ref_bf16, atol=2e-3, rtol=2e-3), "mismatch vs bf16 mirror"

        # (b) semantics check vs the f32 PyTorch-equivalent reference (bf16-limited tolerance).
        ref = reference_forward(x, linears, bns)
        assert jnp.allclose(logits, ref, atol=8e-2, rtol=8e-2), "mismatch vs f32 reference"

    print("KERNEL_OK")
</pallas_src>

<mosaic_0001>
module attributes {stable_mosaic.version = 11 : i64} {
  func.func @_mlp2_kernel(%arg0: i32, %arg1: memref<40x32xbf16, #tpu.memory_space<vmem>>, %arg2: memref<32x16xbf16, #tpu.memory_space<vmem>>, %arg3: memref<1x16xf32, #tpu.memory_space<vmem>>, %arg4: memref<16x4xbf16, #tpu.memory_space<vmem>>, %arg5: memref<1x4xf32, #tpu.memory_space<vmem>>, %arg6: memref<40x4xf32, #tpu.memory_space<vmem>>) attributes {dimension_semantics = [#tpu.dimension_semantics<parallel>], iteration_bounds = array<i64: 1>, scalar_prefetch = 0 : i64, scratch_operands = 0 : i64, tpu.core_type = #tpu.core_type<tc>, window_params = [{transform_indices = @transform_0, window_bounds = array<i64: 40, 32>}, {pipeline_mode = #tpu.pipeline_mode<synchronous>, transform_indices = @transform_1, window_bounds = array<i64: 32, 16>}, {pipeline_mode = #tpu.pipeline_mode<synchronous>, transform_indices = @transform_2, window_bounds = array<i64: 1, 16>}, {pipeline_mode = #tpu.pipeline_mode<synchronous>, transform_indices = @transform_3, window_bounds = array<i64: 16, 4>}, {pipeline_mode = #tpu.pipeline_mode<synchronous>, transform_indices = @transform_4, window_bounds = array<i64: 1, 4>}, {transform_indices = @transform_5, window_bounds = array<i64: 40, 4>}]} {
    %c0 = arith.constant 0 : index
    %c0_0 = arith.constant 0 : index
    %0 = vector.load %arg1[%c0, %c0_0] : memref<40x32xbf16, #tpu.memory_space<vmem>>, vector<40x32xbf16>
    %c0_1 = arith.constant 0 : index
    %c0_2 = arith.constant 0 : index
    %1 = vector.load %arg2[%c0_1, %c0_2] : memref<32x16xbf16, #tpu.memory_space<vmem>>, vector<32x16xbf16>
    %c0_3 = arith.constant 0 : index
    %c0_4 = arith.constant 0 : index
    %2 = vector.load %arg3[%c0_3, %c0_4] : memref<1x16xf32, #tpu.memory_space<vmem>>, vector<1x16xf32>
    %cst = arith.constant dense<0.000000e+00> : vector<40x16xf32>
    %3 = tpu.matmul %0, %1, %cst {dimension_numbers = #tpu.dot_dimension_numbers<[1], [0], [0], [1], [0, 0, 1, 1], [], []>} : vector<40x32xbf16>, vector<32x16xbf16>, vector<40x16xf32> -> vector<40x16xf32>
    %4 = vector.broadcast %2 : vector<1x16xf32> to vector<40x16xf32>
    %5 = arith.addf %3, %4 : vector<40x16xf32>
    %cst_5 = arith.constant 0.000000e+00 : f32
    %6 = vector.broadcast %cst_5 : f32 to vector<40x16xf32>
    %7 = arith.maximumf %5, %6 : vector<40x16xf32>
    %8 = arith.truncf %7 : vector<40x16xf32> to vector<40x16xbf16>
    %c0_6 = arith.constant 0 : index
    %c0_7 = arith.constant 0 : index
    %9 = vector.load %arg4[%c0_6, %c0_7] : memref<16x4xbf16, #tpu.memory_space<vmem>>, vector<16x4xbf16>
    %c0_8 = arith.constant 0 : index
    %c0_9 = arith.constant 0 : index
    %10 = vector.load %arg5[%c0_8, %c0_9] : memref<1x4xf32, #tpu.memory_space<vmem>>, vector<1x4xf32>
    %cst_10 = arith.constant dense<0.000000e+00> : vector<40x4xf32>
    %11 = tpu.matmul %8, %9, %cst_10 {dimension_numbers = #tpu.dot_dimension_numbers<[1], [0], [0], [1], [0, 0, 1, 1], [], []>} : vector<40x16xbf16>, vector<16x4xbf16>, vector<40x4xf32> -> vector<40x4xf32>
    %12 = vector.broadcast %10 : vector<1x4xf32> to vector<40x4xf32>
    %13 = arith.addf %11, %12 : vector<40x4xf32>
    %c0_11 = arith.constant 0 : index
    %c0_12 = arith.constant 0 : index
    %14 = vector.load %arg6[%c0_11, %c0_12] : memref<40x4xf32, #tpu.memory_space<vmem>>, vector<40x4xf32>
    tpu.vector_store %arg6[%c0_11, %c0_12], %13 {strides = array<i32>} : memref<40x4xf32, #tpu.memory_space<vmem>>, vector<40x4xf32>,
    return
  }
  func.func @transform_0(%arg0: i32) -> (i32, i32) {
    %c0_i32 = arith.constant 0 : i32
    %c0_i32_0 = arith.constant 0 : i32
    return %arg0, %c0_i32 : i32, i32
  }
  func.func @transform_1(%arg0: i32) -> (i32, i32) {
    %c0_i32 = arith.constant 0 : i32
    %c0_i32_0 = arith.constant 0 : i32
    %c0_i32_1 = arith.constant 0 : i32
    return %c0_i32, %c0_i32_0 : i32, i32
  }
  func.func @transform_2(%arg0: i32) -> (i32, i32) {
    %c0_i32 = arith.constant 0 : i32
    %c0_i32_0 = arith.constant 0 : i32
    %c0_i32_1 = arith.constant 0 : i32
    return %c0_i32, %c0_i32_0 : i32, i32
  }
  func.func @transform_3(%arg0: i32) -> (i32, i32) {
    %c0_i32 = arith.constant 0 : i32
    %c0_i32_0 = arith.constant 0 : i32
    %c0_i32_1 = arith.constant 0 : i32
    return %c0_i32, %c0_i32_0 : i32, i32
  }
  func.func @transform_4(%arg0: i32) -> (i32, i32) {
    %c0_i32 = arith.constant 0 : i32
    %c0_i32_0 = arith.constant 0 : i32
    %c0_i32_1 = arith.constant 0 : i32
    return %c0_i32, %c0_i32_0 : i32, i32
  }
  func.func @transform_5(%arg0: i32) -> (i32, i32) {
    %c0_i32 = arith.constant 0 : i32
    %c0_i32_0 = arith.constant 0 : i32
    return %arg0, %c0_i32 : i32, i32
  }
}

module attributes {stable_mosaic.version = 11 : i64} {
  func.func @_mlp2_kernel(%arg0: i32, %arg1: memref<40x32xbf16, #tpu.memory_space<vmem>>, %arg2: memref<32x16xbf16, #tpu.memory_space<vmem>>, %arg3: memref<1x16xf32, #tpu.memory_space<vmem>>, %arg4: memref<16x4xbf16, #tpu.memory_space<vmem>>, %arg5: memref<1x4xf32, #tpu.memory_space<vmem>>, %arg6: memref<40x4xf32, #tpu.memory_space<vmem>>) attributes {dimension_semantics = [#tpu.dimension_semantics<parallel>], iteration_bounds = array<i64: 1>, scalar_prefetch = 0 : i64, scratch_operands = 0 : i64, tpu.core_type = #tpu.core_type<tc>, window_params = [{transform_indices = @transform_0, window_bounds = array<i64: 40, 32>}, {pipeline_mode = #tpu.pipeline_mode<synchronous>, transform_indices = @transform_1, window_bounds = array<i64: 32, 16>}, {pipeline_mode = #tpu.pipeline_mode<synchronous>, transform_indices = @transform_2, window_bounds = array<i64: 1, 16>}, {pipeline_mode = #tpu.pipeline_mode<synchronous>, transform_indices = @transform_3, window_bounds = array<i64: 16, 4>}, {pipeline_mode = #tpu.pipeline_mode<synchronous>, transform_indices = @transform_4, window_bounds = array<i64: 1, 4>}, {transform_indices = @transform_5, window_bounds = array<i64: 40, 4>}]} {
    %c0 = arith.constant 0 : index
    %c0_0 = arith.constant 0 : index
    %0 = vector.load %arg1[%c0, %c0_0] : memref<40x32xbf16, #tpu.memory_space<vmem>>, vector<40x32xbf16>
    %c0_1 = arith.constant 0 : index
    %c0_2 = arith.constant 0 : index
    %1 = vector.load %arg2[%c0_1, %c0_2] : memref<32x16xbf16, #tpu.memory_space<vmem>>, vector<32x16xbf16>
    %c0_3 = arith.constant 0 : index
    %c0_4 = arith.constant 0 : index
    %2 = vector.load %arg3[%c0_3, %c0_4] : memref<1x16xf32, #tpu.memory_space<vmem>>, vector<1x16xf32>
    %cst = arith.constant dense<0.000000e+00> : vector<40x16xf32>
    %3 = tpu.matmul %0, %1, %cst {dimension_numbers = #tpu.dot_dimension_numbers<[1], [0], [0], [1], [0, 0, 1, 1], [], []>} : vector<40x32xbf16>, vector<32x16xbf16>, vector<40x16xf32> -> vector<40x16xf32>
    %4 = vector.broadcast %2 : vector<1x16xf32> to vector<40x16xf32>
    %5 = arith.addf %3, %4 : vector<40x16xf32>
    %cst_5 = arith.constant 0.000000e+00 : f32
    %6 = vector.broadcast %cst_5 : f32 to vector<40x16xf32>
    %7 = arith.maximumf %5, %6 : vector<40x16xf32>
    %8 = arith.truncf %7 : vector<40x16xf32> to vector<40x16xbf16>
    %c0_6 = arith.constant 0 : index
    %c0_7 = arith.constant 0 : index
    %9 = vector.load %arg4[%c0_6, %c0_7] : memref<16x4xbf16, #tpu.memory_space<vmem>>, vector<16x4xbf16>
    %c0_8 = arith.constant 0 : index
    %c0_9 = arith.constant 0 : index
    %10 = vector.load %arg5[%c0_8, %c0_9] : memref<1x4xf32, #tpu.memory_space<vmem>>, vector<1x4xf32>
    %cst_10 = arith.constant dense<0.000000e+00> : vector<40x4xf32>
    %11 = tpu.matmul %8, %9, %cst_10 {dimension_numbers = #tpu.dot_dimension_numbers<[1], [0], [0], [1], [0, 0, 1, 1], [], []>} : vector<40x16xbf16>, vector<16x4xbf16>, vector<40x4xf32> -> vector<40x4xf32>
    %12 = vector.broadcast %10 : vector<1x4xf32> to vector<40x4xf32>
    %13 = arith.addf %11, %12 : vector<40x4xf32>
    %c0_11 = arith.constant 0 : index
    %c0_12 = arith.constant 0 : index
    %14 = vector.load %arg6[%c0_11, %c0_12] : memref<40x4xf32, #tpu.memory_space<vmem>>, vector<40x4xf32>
    tpu.vector_store %arg6[%c0_11, %c0_12], %13 {strides = array<i32>} : memref<40x4xf32, #tpu.memory_space<vmem>>, vector<40x4xf32>,
    return
  }
  func.func @transform_0(%arg0: i32) -> (i32, i32) {
    %c0_i32 = arith.constant 0 : i32
    %c0_i32_0 = arith.constant 0 : i32
    return %arg0, %c0_i32 : i32, i32
  }
  func.func @transform_1(%arg0: i32) -> (i32, i32) {
    %c0_i32 = arith.constant 0 : i32
    %c0_i32_0 = arith.constant 0 : i32
    %c0_i32_1 = arith.constant 0 : i32
    return %c0_i32, %c0_i32_0 : i32, i32
  }
  func.func @transform_2(%arg0: i32) -> (i32, i32) {
    %c0_i32 = arith.constant 0 : i32
    %c0_i32_0 = arith.constant 0 : i32
    %c0_i32_1 = arith.constant 0 : i32
    return %c0_i32, %c0_i32_0 : i32, i32
  }
  func.func @transform_3(%arg0: i32) -> (i32, i32) {
    %c0_i32 = arith.constant 0 : i32
    %c0_i32_0 = arith.constant 0 : i32
    %c0_i32_1 = arith.constant 0 : i32
    return %c0_i32, %c0_i32_0 : i32, i32
  }
  func.func @transform_4(%arg0: i32) -> (i32, i32) {
    %c0_i32 = arith.constant 0 : i32
    %c0_i32_0 = arith.constant 0 : i32
    %c0_i32_1 = arith.constant 0 : i32
    return %c0_i32, %c0_i32_0 : i32, i32
  }
  func.func @transform_5(%arg0: i32) -> (i32, i32) {
    %c0_i32 = arith.constant 0 : i32
    %c0_i32_0 = arith.constant 0 : i32
    return %arg0, %c0_i32 : i32, i32
  }
}

</mosaic_0001>

<bundles_post_ra>
// kernel: tpu_custom_call.1
= control target key start
LH: loop header
LB: loop body
LE: loop exit
PB: predicated region body
PF: predicated region fallthrough
CT: control target
= control target key end

     0   :  { %v288_v0 = vmov 0.0   ;;  %vm289_vm0 = vmmov 0   ;;  %vm62_vm1 = vcmask 261120   ;;  %vm151_vm2 = vcmask 130048   ;;  %s373_s1 = inlined_call_operand.vmem [shape: bf16[32,16], index: 1, kind: input, shape index: {}]   ;;  %s374_s0 = inlined_call_operand.vmem [shape: bf16[37,32], index: 0, kind: input, shape index: {}]   ;;  %s375_s3 = inlined_call_operand.vmem [shape: bf16[16,4], index: 3, kind: input, shape index: {}]   ;;  %s376_s2 = inlined_call_operand.vmem [shape: f32[1,16], index: 2, kind: input, shape index: {}]   ;;  %s377_s4 = inlined_call_operand.vmem [shape: f32[1,4], index: 4, kind: input, shape index: {}]   ;;  %s378_s5 = inlined_call_operand.vmem [shape: f32[37,4], index: 5, kind: output, shape index: {}]  }
   0x1   :  { %250 = vmatprep.subr.bf16.mxu0 %v288_v0  ;;  %v282_v1 = vld [vmem:[%s373_s1] sm:$0xff]   ;;  %254 = vmatprep.mubr.msk.bf16.mxu0 %vm289_vm0, %v288_v0  ;;  %v283_v2 = vld [vmem:[%s373_s1 + $0x8] sm:$0xff]   ;;  %v286_v5 = vld [vmem:[%s374_s0 + $0x10] ss:$0 sps:$4 sm:$0xff]   ;;  %vm217_vm3 = vcmask 31744  }
   0x2   :  { %266 = vmatprep.subr.bf16.mxu1 %v288_v0  ;;  %268 = vmatprep.mubr.msk.bf16.mxu1 %vm289_vm0, %v288_v0  ;;  %v284_v3 = vld [vmem:[%s374_s0] sm:$0xff]   ;;  %v285_v4 = vld [vmem:[%s374_s0 + $0x8] sm:$0xff]  }
   0x3   :  { %251 = vmatpush3.bf16.msra.mxu0 %v282_v1  ;;  %v287_v6 = vld [vmem:[%s375_s3] sm:$0xff]  }
   0x4   :  { %252 = vmatprep.subr.bf16.mxu0 %v288_v0  ;;  %267 = vmatpush3.bf16.msra.mxu1 %v287_v6  ;;  %v227_v7 = vld [vmem:[%s376_s2] ss:$0 sm:$0xff] }
   0x5   :  { %v236_v33 = vld [vmem:[%s377_s4] ss:$0 sm:$0xff] }
   0x7   :  { %253 = vmatpush3.bf16.msra.mxu0 %v283_v2 }
   0xa   :  { %255 = vmatmul.mubr.msk.bf16.vlgmr.msra.gmra.mrb[0].mxu0 %vm62_vm1, %v284_v3 }
   0xb   :  { %258 = vmatprep.mubr.msk.bf16.mxu0 %vm289_vm0, %v288_v0 }
  0x12   :  { %259 = vmatmul.mubr.msk.bf16.gmra.mrb[4].mxu0 %vm62_vm1, %v285_v4 }
  0x13   :  { %262 = vmatprep.mubr.msk.bf16.mxu0 %vm289_vm0, %v288_v0 }
  0x1a   :  { %263 = vmatmul.mubr.msk.bf16.gmra.mrb[8].mxu0 %vm62_vm1, %v286_v5 }
  0xdd   :  { %v106_v8 = vpop.f32.mrb[0].mxu0 }
  0xde   :  { %v107_v9 = vadd.f32 %v227_v7, %v106_v8  ;;  %v256_v10 = vpop.f32.mrb[1].mxu0 }
  0xdf   :  { %v109_v11 = vpop.f32.mrb[2].mxu0 }
  0xe0   :  { %v110_v12 = vadd.f32 %v227_v7, %v109_v11  ;;  %v257_v13 = vpop.f32.mrb[3].mxu0  ;;  %v128_v14 = vmax.f32 %v107_v9, 0.0 }
  0xe2   :  { %v129_v15 = vmax.f32 %v110_v12, 0.0 }
  0xe4   :  { %v133_v16 = vpack.c.bf16 %v129_v15, %v128_v14 }
  0xe5   :  { %v114_v17 = vpop.f32.mrb[4].mxu0 }
  0xe6   :  { %v115_v18 = vadd.f32 %v227_v7, %v114_v17  ;;  %v260_v19 = vpop.f32.mrb[5].mxu0  ;;  %269 = vmatmul.mubr.msk.bf16.vlgmr.msra.gmra.mrb[0].mxu1 %vm151_vm2, %v133_v16 }
  0xe7   :  { %v117_v20 = vpop.f32.mrb[6].mxu0  ;;  %272 = vmatprep.mubr.msk.bf16.mxu1 %vm289_vm0, %v288_v0 }
  0xe8   :  { %v118_v21 = vadd.f32 %v227_v7, %v117_v20  ;;  %v261_v22 = vpop.f32.mrb[7].mxu0  ;;  %v130_v23 = vmax.f32 %v115_v18, 0.0 }
  0xea   :  { %v131_v24 = vmax.f32 %v118_v21, 0.0 }
  0xec   :  { %v134_v25 = vpack.c.bf16 %v131_v24, %v130_v23 }
  0xed   :  { %v122_v26 = vpop.f32.mrb[8].mxu0 }
  0xee   :  { %v123_v27 = vadd.f32 %v227_v7, %v122_v26  ;;  %v264_v28 = vpop.f32.mrb[9].mxu0  ;;  %273 = vmatmul.mubr.msk.bf16.gmra.mrb[4].mxu1 %vm151_vm2, %v134_v25 }
  0xef   :  { %v125_v29 = vpop.f32.mrb[10].mxu0  ;;  %276 = vmatprep.mubr.msk.bf16.mxu1 %vm289_vm0, %v288_v0 }
  0xf0   :  { %v132_v30 = vmax.f32 %v123_v27, 0.0  ;;  %v265_v31 = vpop.f32.mrb[11].mxu0 }
  0xf2   :  { %v135_v32 = vpack.c.bf16 %v132_v30, %v132_v30 }
  0xf6   :  { %277 = vmatmul.mubr.msk.bf16.gmra.mrb[8].mxu1 %vm151_vm2, %v135_v32 }
 0x1b9   :  { %v195_v34 = vpop.f32.mrb[0].mxu1 }
 0x1ba   :  { %v196_v35 = vadd.f32 %v236_v33, %v195_v34  ;;  %v270_v36 = vpop.f32.mrb[1].mxu1 }
 0x1bb   :  { %v198_v37 = vpop.f32.mrb[2].mxu1 }
 0x1bc   :  { %218 = vst.msk [vmem:[%s378_s5] sm:$0xff] %vm217_vm3, %v196_v35  ;;  %v199_v38 = vadd.f32 %v236_v33, %v198_v37  ;;  %v271_v39 = vpop.f32.mrb[3].mxu1 }
 0x1be   :  { %219 = vst.msk [vmem:[%s378_s5 + $0x8] sm:$0xff] %vm217_vm3, %v199_v38 }
 0x1c1   :  { %v203_v40 = vpop.f32.mrb[4].mxu1 }
 0x1c2   :  { %v204_v41 = vadd.f32 %v236_v33, %v203_v40  ;;  %v274_v42 = vpop.f32.mrb[5].mxu1 }
 0x1c3   :  { %v206_v43 = vpop.f32.mrb[6].mxu1 }
 0x1c4   :  { %220 = vst.msk [vmem:[%s378_s5 + $0x10] sm:$0xff] %vm217_vm3, %v204_v41  ;;  %v207_v44 = vadd.f32 %v236_v33, %v206_v43  ;;  %v275_v45 = vpop.f32.mrb[7].mxu1 }
 0x1c6   :  { %221 = vst.msk [vmem:[%s378_s5 + $0x18] sm:$0xff] %vm217_vm3, %v207_v44 }
 0x1c9   :  { %v211_v46 = vpop.f32.mrb[8].mxu1 }
 0x1ca   :  { %v212_v47 = vadd.f32 %v236_v33, %v211_v46  ;;  %v278_v48 = vpop.f32.mrb[9].mxu1 }
 0x1cb   :  { %v214_v49 = vpop.f32.mrb[10].mxu1 }
 0x1cc   :  { %222 = vst.msk [vmem:[%s378_s5 + $0x20] sm:$0xff] %vm217_vm3, %v212_v47  ;;  %v279_v50 = vpop.f32.mrb[11].mxu1 }

// kernel: tpu_custom_call.1
= control target key start
LH: loop header
LB: loop body
LE: loop exit
PB: predicated region body
PF: predicated region fallthrough
CT: control target
= control target key end

     0   :  { %v288_v0 = vmov 0.0   ;;  %vm289_vm0 = vmmov 0   ;;  %vm62_vm1 = vcmask 261120   ;;  %vm151_vm2 = vcmask 130048   ;;  %s373_s1 = inlined_call_operand.vmem [shape: bf16[32,16], index: 1, kind: input, shape index: {}]   ;;  %s374_s0 = inlined_call_operand.vmem [shape: bf16[37,32], index: 0, kind: input, shape index: {}]   ;;  %s375_s3 = inlined_call_operand.vmem [shape: bf16[16,4], index: 3, kind: input, shape index: {}]   ;;  %s376_s2 = inlined_call_operand.vmem [shape: f32[1,16], index: 2, kind: input, shape index: {}]   ;;  %s377_s4 = inlined_call_operand.vmem [shape: f32[1,4], index: 4, kind: input, shape index: {}]   ;;  %s378_s5 = inlined_call_operand.vmem [shape: f32[37,4], index: 5, kind: output, shape index: {}]  }
   0x1   :  { %250 = vmatprep.subr.bf16.mxu0 %v288_v0  ;;  %v282_v1 = vld [vmem:[%s373_s1] sm:$0xff]   ;;  %254 = vmatprep.mubr.msk.bf16.mxu0 %vm289_vm0, %v288_v0  ;;  %v283_v2 = vld [vmem:[%s373_s1 + $0x8] sm:$0xff]   ;;  %v286_v5 = vld [vmem:[%s374_s0 + $0x10] ss:$0 sps:$4 sm:$0xff]   ;;  %vm217_vm3 = vcmask 31744  }
   0x2   :  { %266 = vmatprep.subr.bf16.mxu1 %v288_v0  ;;  %268 = vmatprep.mubr.msk.bf16.mxu1 %vm289_vm0, %v288_v0  ;;  %v284_v3 = vld [vmem:[%s374_s0] sm:$0xff]   ;;  %v285_v4 = vld [vmem:[%s374_s0 + $0x8] sm:$0xff]  }
   0x3   :  { %251 = vmatpush3.bf16.msra.mxu0 %v282_v1  ;;  %v287_v6 = vld [vmem:[%s375_s3] sm:$0xff]  }
   0x4   :  { %252 = vmatprep.subr.bf16.mxu0 %v288_v0  ;;  %267 = vmatpush3.bf16.msra.mxu1 %v287_v6  ;;  %v227_v7 = vld [vmem:[%s376_s2] ss:$0 sm:$0xff] }
   0x5   :  { %v236_v33 = vld [vmem:[%s377_s4] ss:$0 sm:$0xff] }
   0x7   :  { %253 = vmatpush3.bf16.msra.mxu0 %v283_v2 }
   0xa   :  { %255 = vmatmul.mubr.msk.bf16.vlgmr.msra.gmra.mrb[0].mxu0 %vm62_vm1, %v284_v3 }
   0xb   :  { %258 = vmatprep.mubr.msk.bf16.mxu0 %vm289_vm0, %v288_v0 }
  0x12   :  { %259 = vmatmul.mubr.msk.bf16.gmra.mrb[4].mxu0 %vm62_vm1, %v285_v4 }
  0x13   :  { %262 = vmatprep.mubr.msk.bf16.mxu0 %vm289_vm0, %v288_v0 }
  0x1a   :  { %263 = vmatmul.mubr.msk.bf16.gmra.mrb[8].mxu0 %vm62_vm1, %v286_v5 }
  0xdd   :  { %v106_v8 = vpop.f32.mrb[0].mxu0 }
  0xde   :  { %v107_v9 = vadd.f32 %v227_v7, %v106_v8  ;;  %v256_v10 = vpop.f32.mrb[1].mxu0 }
  0xdf   :  { %v109_v11 = vpop.f32.mrb[2].mxu0 }
  0xe0   :  { %v110_v12 = vadd.f32 %v227_v7, %v109_v11  ;;  %v257_v13 = vpop.f32.mrb[3].mxu0  ;;  %v128_v14 = vmax.f32 %v107_v9, 0.0 }
  0xe2   :  { %v129_v15 = vmax.f32 %v110_v12, 0.0 }
  0xe4   :  { %v133_v16 = vpack.c.bf16 %v129_v15, %v128_v14 }
  0xe5   :  { %v114_v17 = vpop.f32.mrb[4].mxu0 }
  0xe6   :  { %v115_v18 = vadd.f32 %v227_v7, %v114_v17  ;;  %v260_v19 = vpop.f32.mrb[5].mxu0  ;;  %269 = vmatmul.mubr.msk.bf16.vlgmr.msra.gmra.mrb[0].mxu1 %vm151_vm2, %v133_v16 }
  0xe7   :  { %v117_v20 = vpop.f32.mrb[6].mxu0  ;;  %272 = vmatprep.mubr.msk.bf16.mxu1 %vm289_vm0, %v288_v0 }
  0xe8   :  { %v118_v21 = vadd.f32 %v227_v7, %v117_v20  ;;  %v261_v22 = vpop.f32.mrb[7].mxu0  ;;  %v130_v23 = vmax.f32 %v115_v18, 0.0 }
  0xea   :  { %v131_v24 = vmax.f32 %v118_v21, 0.0 }
  0xec   :  { %v134_v25 = vpack.c.bf16 %v131_v24, %v130_v23 }
  0xed   :  { %v122_v26 = vpop.f32.mrb[8].mxu0 }
  0xee   :  { %v123_v27 = vadd.f32 %v227_v7, %v122_v26  ;;  %v264_v28 = vpop.f32.mrb[9].mxu0  ;;  %273 = vmatmul.mubr.msk.bf16.gmra.mrb[4].mxu1 %vm151_vm2, %v134_v25 }
  0xef   :  { %v125_v29 = vpop.f32.mrb[10].mxu0  ;;  %276 = vmatprep.mubr.msk.bf16.mxu1 %vm289_vm0, %v288_v0 }
  0xf0   :  { %v132_v30 = vmax.f32 %v123_v27, 0.0  ;;  %v265_v31 = vpop.f32.mrb[11].mxu0 }
  0xf2   :  { %v135_v32 = vpack.c.bf16 %v132_v30, %v132_v30 }
  0xf6   :  { %277 = vmatmul.mubr.msk.bf16.gmra.mrb[8].mxu1 %vm151_vm2, %v135_v32 }
 0x1b9   :  { %v195_v34 = vpop.f32.mrb[0].mxu1 }
 0x1ba   :  { %v196_v35 = vadd.f32 %v236_v33, %v195_v34  ;;  %v270_v36 = vpop.f32.mrb[1].mxu1 }
 0x1bb   :  { %v198_v37 = vpop.f32.mrb[2].mxu1 }
 0x1bc   :  { %218 = vst.msk [vmem:[%s378_s5] sm:$0xff] %vm217_vm3, %v196_v35  ;;  %v199_v38 = vadd.f32 %v236_v33, %v198_v37  ;;  %v271_v39 = vpop.f32.mrb[3].mxu1 }
 0x1be   :  { %219 = vst.msk [vmem:[%s378_s5 + $0x8] sm:$0xff] %vm217_vm3, %v199_v38 }
 0x1c1   :  { %v203_v40 = vpop.f32.mrb[4].mxu1 }
 0x1c2   :  { %v204_v41 = vadd.f32 %v236_v33, %v203_v40  ;;  %v274_v42 = vpop.f32.mrb[5].mxu1 }
 0x1c3   :  { %v206_v43 = vpop.f32.mrb[6].mxu1 }
 0x1c4   :  { %220 = vst.msk [vmem:[%s378_s5 + $0x10] sm:$0xff] %vm217_vm3, %v204_v41  ;;  %v207_v44 = vadd.f32 %v236_v33, %v206_v43  ;;  %v275_v45 = vpop.f32.mrb[7].mxu1 }
 0x1c6   :  { %221 = vst.msk [vmem:[%s378_s5 + $0x18] sm:$0xff] %vm217_vm3, %v207_v44 }
 0x1c9   :  { %v211_v46 = vpop.f32.mrb[8].mxu1 }
 0x1ca   :  { %v212_v47 = vadd.f32 %v236_v33, %v211_v46  ;;  %v278_v48 = vpop.f32.mrb[9].mxu1 }
 0x1cb   :  { %v214_v49 = vpop.f32.mrb[10].mxu1 }
 0x1cc   :  { %222 = vst.msk [vmem:[%s378_s5 + $0x20] sm:$0xff] %vm217_vm3, %v212_v47  ;;  %v279_v50 = vpop.f32.mrb[11].mxu1 }

</bundles_post_ra>
